<compile_context>
chip_gen: v6e
topology: v6e:2x2x1
jax: 0.10.0
libtpu: 0.0.40
codegen_flags: <defaults>
</compile_context>

<pallas_src>
import jax
import jax.numpy as jnp
from jax import lax
from jax.experimental import pallas as pl
from jax.experimental.pallas import tpu as pltpu

# ------------------------- problem sizes (small, synthetic) -------------------------
BATCH = 8
INPUT_DIM = 32
OUTPUT_DIM = 32
NUM_EXPERTS = 4
TOP_K = 2

H_ALL = NUM_EXPERTS * OUTPUT_DIM  # 128 -> lane-dense / vreg-aligned


def _moe_kernel(x_ref, wcat_ref, bcat_ref, w2aug_ref, out_ref):
    """Single grid step; everything lives in one body, one output write.

    x_ref     : (B, D_in)
    wcat_ref  : (D_in, E*D_out + E)   [fc1 of all experts | gate]  lane-dense
    bcat_ref  : (1,    E*D_out + E)   [fc1 biases        | gate bias]
    w2aug_ref : (E*D_out + E, D_out)  [stacked per-expert fc2 w | per-expert fc2 b]
    out_ref   : (B, D_out)
    """
    B = x_ref.shape[0]
    D = OUTPUT_DIM
    E = NUM_EXPERTS

    x = x_ref[...]                                              # [B, D_in]

    # ---------- fused fc1 (all experts) + gate logits: ONE MXU pass ----------
    y = jnp.dot(x, wcat_ref[...],
                preferred_element_type=jnp.float32) + bcat_ref[...]  # [B, E*D_out + E]
    h_all = jnp.maximum(y[:, :H_ALL], 0.0)                      # [B, E*D_out] (lane-aligned)
    logits = y[:, H_ALL:]                                       # [B, E]

    # ---------------- gating: softmax -> top-k mask ----------------
    m = jnp.max(logits, axis=1, keepdims=True)
    ex = jnp.exp(logits - m)
    denom = jnp.sum(ex, axis=1, keepdims=True)
    gw = ex * pl.reciprocal(denom)                              # exact recip -> EUP slot

    if TOP_K < E:
        # rank_i = #{j : gw_j > gw_i or (gw_j == gw_i and j < i)}; keep iff rank < TOP_K.
        # (Deterministic tie-break matching torch.topk's lowest-index preference.)
        col = lax.broadcasted_iota(jnp.int32, gw.shape, 1)
        rank = jnp.zeros(gw.shape, jnp.int32)
        for j in range(E):                                      # E small -> fully unrolled
            gj = gw[:, j:j + 1]
            beats = (gj > gw) | ((gj == gw) & (j < col))
            rank = rank + beats.astype(jnp.int32)
        gw = jnp.where(rank < TOP_K, gw, 0.0)
        # NOTE: no renormalization of kept values — matches the PyTorch module.

    # ---------------- fc2 + gated accumulation: ONE fused MXU matmul ----------------
    # Gate scaling applied AFTER the ReLU; expand gw per expert slice.
    gw_exp = jnp.concatenate(
        [jnp.broadcast_to(gw[:, e:e + 1], (B, D)) for e in range(E)], axis=1)  # [B, E*D_out]

    # [gw_exp*h_all | gw] @ [[w2_e stacked],[b2_e stacked]]
    #   = sum_e gw_e * (h_e @ w2_e) + sum_e gw_e * b2_e
    lhs = jnp.concatenate([gw_exp * h_all, gw], axis=1)         # [B, E*D_out + E]
    out_ref[...] = jnp.dot(lhs, w2aug_ref[...],
                           preferred_element_type=jnp.float32)  # [B, D_out]
    # TODO(synk): D_out=32 -> masked vst; at scale, pad/batch outputs to a
    # lane-dense (multiple-of-128) slab and slice outside the kernel.


def prepare_moe_params(wg, bg, w1, b1, w2, b2):
    """One-time parameter re-layout (hoisted out of the per-call forward path).

    wg: [D_in, E]  bg: [1, E]
    w1: [E, D_in, D_out]  b1: [E, 1, D_out]
    w2: [E, D_out, D_out] b2: [E, 1, D_out]
    """
    E, d_in, d_out = w1.shape
    w1_cat = jnp.transpose(w1, (1, 0, 2)).reshape(d_in, E * d_out)   # [D_in, E*D_out]
    b1_cat = b1.reshape(1, E * d_out)
    w_cat = jnp.concatenate([w1_cat, wg], axis=1)                    # [D_in, E*D_out + E]
    b_cat = jnp.concatenate([b1_cat, bg], axis=1)                    # [1, E*D_out + E]
    w2_aug = jnp.concatenate([w2.reshape(E * d_out, d_out),          # stacked fc2 weights
                              b2.reshape(E, d_out)], axis=0)         # + fc2 biases
    # TODO(synk): on v6e/v7x cast these (and x) to bf16 for the MXU operands and
    # keep f32 accumulation/epilogue; kept f32 here to hold the 1e-4 tolerance.
    return w_cat, b_cat, w2_aug


def moe_forward(x, w_cat, b_cat, w2_aug):
    """x: [B, D_in]; prepared params from prepare_moe_params."""
    B, d_in = x.shape
    d_out = w2_aug.shape[1]
    E = NUM_EXPERTS

    k_aug = E * d_out + E
    flops = 2 * B * d_in * k_aug + 2 * B * k_aug * d_out
    bytes_accessed = 4 * (x.size + w_cat.size + b_cat.size + w2_aug.size + B * d_out)
    cost = pl.CostEstimate(flops=flops, transcendentals=B * E,
                           bytes_accessed=bytes_accessed)

    # Single invocation: no grid, every operand is a whole-array VMEM block
    # (total parameter footprint ~25 KiB, far below any VMEM limit).
    # TODO(synk): at realistic MoE sizes add a "parallel" token-grid axis (megacore),
    # re-derive tiles for v7x's 64 MiB VMEM / v5e's 16 MiB scoped default, and set
    # pltpu.CompilerParams(vmem_limit_bytes=...) explicitly.
    vmem = pl.BlockSpec(memory_space=pltpu.MemorySpace.VMEM)
    return pl.pallas_call(
        _moe_kernel,
        out_shape=jax.ShapeDtypeStruct((B, d_out), jnp.float32),
        in_specs=[vmem, vmem, vmem, vmem],
        out_specs=vmem,
        cost_estimate=cost,
    )(x, w_cat, b_cat, w2_aug)


def _reference(x, wg, bg, w1, b1, w2, b2):
    """Plain-JAX reference mirroring the PyTorch forward."""
    logits = x @ wg + bg[0]
    gw = jax.nn.softmax(logits, axis=1)
    if TOP_K < NUM_EXPERTS:
        vals, idx = lax.top_k(gw, TOP_K)
        gw = jnp.zeros_like(gw).at[jnp.arange(gw.shape[0])[:, None], idx].set(vals)
    outs = []
    for e in range(NUM_EXPERTS):
        h = jnp.maximum(x @ w1[e] + b1[e, 0], 0.0)
        outs.append(h @ w2[e] + b2[e, 0])
    outs = jnp.stack(outs, axis=1)                          # [B, E, D_out]
    return jnp.sum(gw[:, :, None] * outs, axis=1)


if __name__ == "__main__":
    key = jax.random.PRNGKey(0)
    ks = jax.random.split(key, 8)

    x = jax.random.normal(ks[0], (BATCH, INPUT_DIM), jnp.float32)

    # deterministic synthetic parameters (shapes match the nn.Linear layers)
    wg = jax.random.normal(ks[1], (INPUT_DIM, NUM_EXPERTS), jnp.float32) * 0.1
    bg = jax.random.normal(ks[2], (1, NUM_EXPERTS), jnp.float32) * 0.1
    w1 = jax.random.normal(ks[3], (NUM_EXPERTS, INPUT_DIM, OUTPUT_DIM), jnp.float32) * 0.1
    b1 = jax.random.normal(ks[4], (NUM_EXPERTS, 1, OUTPUT_DIM), jnp.float32) * 0.1
    w2 = jax.random.normal(ks[5], (NUM_EXPERTS, OUTPUT_DIM, OUTPUT_DIM), jnp.float32) * 0.1
    b2 = jax.random.normal(ks[6], (NUM_EXPERTS, 1, OUTPUT_DIM), jnp.float32) * 0.1

    # One-time parameter re-layout (NOT part of the per-call forward path).
    w_cat, b_cat, w2_aug = jax.tree_util.tree_map(
        jax.block_until_ready, prepare_moe_params(wg, bg, w1, b1, w2, b2))

    out = jax.block_until_ready(moe_forward(x, w_cat, b_cat, w2_aug))

    ref = _reference(x, wg, bg, w1, b1, w2, b2)
    assert jnp.allclose(out, ref, atol=1e-4, rtol=1e-4), "mismatch vs reference"

    print("KERNEL_OK")
</pallas_src>

<mosaic_0001>
module attributes {stable_mosaic.version = 11 : i64} {
  func.func @_moe_kernel(%arg0: memref<8x32xf32, #tpu.memory_space<vmem>>, %arg1: memref<32x132xf32, #tpu.memory_space<vmem>>, %arg2: memref<1x132xf32, #tpu.memory_space<vmem>>, %arg3: memref<132x32xf32, #tpu.memory_space<vmem>>, %arg4: memref<8x32xf32, #tpu.memory_space<vmem>>) attributes {dimension_semantics = [], scalar_prefetch = 0 : i64, scratch_operands = 0 : i64, tpu.core_type = #tpu.core_type<tc>} {
    %c0 = arith.constant 0 : index
    %c0_0 = arith.constant 0 : index
    %0 = vector.load %arg0[%c0, %c0_0] : memref<8x32xf32, #tpu.memory_space<vmem>>, vector<8x32xf32>
    %c0_1 = arith.constant 0 : index
    %c0_2 = arith.constant 0 : index
    %1 = vector.load %arg1[%c0_1, %c0_2] : memref<32x132xf32, #tpu.memory_space<vmem>>, vector<32x132xf32>
    %cst = arith.constant dense<0.000000e+00> : vector<8x132xf32>
    %2 = tpu.matmul %0, %1, %cst {dimension_numbers = #tpu.dot_dimension_numbers<[1], [0], [0], [1], [0, 0, 1, 1], [], []>} : vector<8x32xf32>, vector<32x132xf32>, vector<8x132xf32> -> vector<8x132xf32>
    %c0_3 = arith.constant 0 : index
    %c0_4 = arith.constant 0 : index
    %3 = vector.load %arg2[%c0_3, %c0_4] : memref<1x132xf32, #tpu.memory_space<vmem>>, vector<1x132xf32>
    %4 = vector.broadcast %3 : vector<1x132xf32> to vector<8x132xf32>
    %5 = arith.addf %2, %4 : vector<8x132xf32>
    %6 = vector.extract_strided_slice %5 {offsets = [0, 0], sizes = [8, 128], strides = [1, 1]} : vector<8x132xf32> to vector<8x128xf32>
    %cst_5 = arith.constant 0.000000e+00 : f32
    %7 = vector.broadcast %cst_5 : f32 to vector<8x128xf32>
    %8 = arith.maximumf %6, %7 : vector<8x128xf32>
    %9 = vector.extract_strided_slice %5 {offsets = [0, 128], sizes = [8, 4], strides = [1, 1]} : vector<8x132xf32> to vector<8x4xf32>
    %cst_6 = arith.constant dense<0xFF800000> : vector<8xf32>
    %10 = vector.multi_reduction <maximumf>, %9, %cst_6 [1] : vector<8x4xf32> to vector<8xf32>
    %11 = vector.shape_cast %10 : vector<8xf32> to vector<8x1xf32>
    %12 = vector.broadcast %11 : vector<8x1xf32> to vector<8x4xf32>
    %13 = arith.subf %9, %12 : vector<8x4xf32>
    %14 = math.exp %13 : vector<8x4xf32>
    %cst_7 = arith.constant dense<0.000000e+00> : vector<8xf32>
    %15 = vector.multi_reduction <add>, %14, %cst_7 [1] : vector<8x4xf32> to vector<8xf32>
    %16 = vector.shape_cast %15 : vector<8xf32> to vector<8x1xf32>
    %17 = tpu.reciprocal %16 : vector<8x1xf32> -> vector<8x1xf32>
    %18 = vector.broadcast %17 : vector<8x1xf32> to vector<8x4xf32>
    %19 = arith.mulf %14, %18 : vector<8x4xf32>
    %20 = tpu.iota {dimensions = array<i32: 1>} : vector<8x4xi32>
    %c0_i32 = arith.constant 0 : i32
    %21 = vector.broadcast %c0_i32 : i32 to vector<8x4xi32>
    %22 = vector.extract_strided_slice %19 {offsets = [0, 0], sizes = [8, 1], strides = [1, 1]} : vector<8x4xf32> to vector<8x1xf32>
    %23 = vector.broadcast %22 : vector<8x1xf32> to vector<8x4xf32>
    %24 = arith.cmpf ogt, %23, %19 : vector<8x4xf32>
    %25 = vector.broadcast %22 : vector<8x1xf32> to vector<8x4xf32>
    %26 = arith.cmpf oeq, %25, %19 : vector<8x4xf32>
    %c0_i32_8 = arith.constant 0 : i32
    %27 = vector.broadcast %c0_i32_8 : i32 to vector<8x4xi32>
    %28 = arith.cmpi sgt, %20, %27 : vector<8x4xi32>
    %29 = arith.andi %26, %28 : vector<8x4xi1>
    %30 = arith.ori %24, %29 : vector<8x4xi1>
    %31 = arith.extui %30 : vector<8x4xi1> to vector<8x4xi32>
    %32 = arith.addi %21, %31 : vector<8x4xi32>
    %33 = vector.extract_strided_slice %19 {offsets = [0, 1], sizes = [8, 1], strides = [1, 1]} : vector<8x4xf32> to vector<8x1xf32>
    %34 = vector.broadcast %33 : vector<8x1xf32> to vector<8x4xf32>
    %35 = arith.cmpf ogt, %34, %19 : vector<8x4xf32>
    %36 = vector.broadcast %33 : vector<8x1xf32> to vector<8x4xf32>
    %37 = arith.cmpf oeq, %36, %19 : vector<8x4xf32>
    %c1_i32 = arith.constant 1 : i32
    %38 = vector.broadcast %c1_i32 : i32 to vector<8x4xi32>
    %39 = arith.cmpi sgt, %20, %38 : vector<8x4xi32>
    %40 = arith.andi %37, %39 : vector<8x4xi1>
    %41 = arith.ori %35, %40 : vector<8x4xi1>
    %42 = arith.extui %41 : vector<8x4xi1> to vector<8x4xi32>
    %43 = arith.addi %32, %42 : vector<8x4xi32>
    %44 = vector.extract_strided_slice %19 {offsets = [0, 2], sizes = [8, 1], strides = [1, 1]} : vector<8x4xf32> to vector<8x1xf32>
    %45 = vector.broadcast %44 : vector<8x1xf32> to vector<8x4xf32>
    %46 = arith.cmpf ogt, %45, %19 : vector<8x4xf32>
    %47 = vector.broadcast %44 : vector<8x1xf32> to vector<8x4xf32>
    %48 = arith.cmpf oeq, %47, %19 : vector<8x4xf32>
    %c2_i32 = arith.constant 2 : i32
    %49 = vector.broadcast %c2_i32 : i32 to vector<8x4xi32>
    %50 = arith.cmpi sgt, %20, %49 : vector<8x4xi32>
    %51 = arith.andi %48, %50 : vector<8x4xi1>
    %52 = arith.ori %46, %51 : vector<8x4xi1>
    %53 = arith.extui %52 : vector<8x4xi1> to vector<8x4xi32>
    %54 = arith.addi %43, %53 : vector<8x4xi32>
    %55 = vector.extract_strided_slice %19 {offsets = [0, 3], sizes = [8, 1], strides = [1, 1]} : vector<8x4xf32> to vector<8x1xf32>
    %56 = vector.broadcast %55 : vector<8x1xf32> to vector<8x4xf32>
    %57 = arith.cmpf ogt, %56, %19 : vector<8x4xf32>
    %58 = vector.broadcast %55 : vector<8x1xf32> to vector<8x4xf32>
    %59 = arith.cmpf oeq, %58, %19 : vector<8x4xf32>
    %c3_i32 = arith.constant 3 : i32
    %60 = vector.broadcast %c3_i32 : i32 to vector<8x4xi32>
    %61 = arith.cmpi sgt, %20, %60 : vector<8x4xi32>
    %62 = arith.andi %59, %61 : vector<8x4xi1>
    %63 = arith.ori %57, %62 : vector<8x4xi1>
    %64 = arith.extui %63 : vector<8x4xi1> to vector<8x4xi32>
    %65 = arith.addi %54, %64 : vector<8x4xi32>
    %c2_i32_9 = arith.constant 2 : i32
    %66 = vector.broadcast %c2_i32_9 : i32 to vector<8x4xi32>
    %67 = arith.cmpi slt, %65, %66 : vector<8x4xi32>
    %cst_10 = arith.constant 0.000000e+00 : f32
    %68 = vector.broadcast %cst_10 : f32 to vector<8x4xf32>
    %69 = arith.select %67, %19, %68 : vector<8x4xi1>, vector<8x4xf32>
    %70 = vector.extract_strided_slice %69 {offsets = [0, 0], sizes = [8, 1], strides = [1, 1]} : vector<8x4xf32> to vector<8x1xf32>
    %71 = vector.shape_cast %70 : vector<8x1xf32> to vector<8x1xf32>
    %72 = vector.broadcast %71 : vector<8x1xf32> to vector<8x32xf32>
    %73 = vector.extract_strided_slice %69 {offsets = [0, 1], sizes = [8, 1], strides = [1, 1]} : vector<8x4xf32> to vector<8x1xf32>
    %74 = vector.shape_cast %73 : vector<8x1xf32> to vector<8x1xf32>
    %75 = vector.broadcast %74 : vector<8x1xf32> to vector<8x32xf32>
    %76 = vector.extract_strided_slice %69 {offsets = [0, 2], sizes = [8, 1], strides = [1, 1]} : vector<8x4xf32> to vector<8x1xf32>
    %77 = vector.shape_cast %76 : vector<8x1xf32> to vector<8x1xf32>
    %78 = vector.broadcast %77 : vector<8x1xf32> to vector<8x32xf32>
    %79 = vector.extract_strided_slice %69 {offsets = [0, 3], sizes = [8, 1], strides = [1, 1]} : vector<8x4xf32> to vector<8x1xf32>
    %80 = vector.shape_cast %79 : vector<8x1xf32> to vector<8x1xf32>
    %81 = vector.broadcast %80 : vector<8x1xf32> to vector<8x32xf32>
    %82 = tpu.concatenate %72, %75, %78, %81 in 1 : vector<8x32xf32>, vector<8x32xf32>, vector<8x32xf32>, vector<8x32xf32> -> vector<8x128xf32>
    %83 = arith.mulf %82, %8 : vector<8x128xf32>
    %84 = tpu.concatenate %83, %69 in 1 : vector<8x128xf32>, vector<8x4xf32> -> vector<8x132xf32>
    %c0_11 = arith.constant 0 : index
    %c0_12 = arith.constant 0 : index
    %85 = vector.load %arg3[%c0_11, %c0_12] : memref<132x32xf32, #tpu.memory_space<vmem>>, vector<132x32xf32>
    %cst_13 = arith.constant dense<0.000000e+00> : vector<8x32xf32>
    %86 = tpu.matmul %84, %85, %cst_13 {dimension_numbers = #tpu.dot_dimension_numbers<[1], [0], [0], [1], [0, 0, 1, 1], [], []>} : vector<8x132xf32>, vector<132x32xf32>, vector<8x32xf32> -> vector<8x32xf32>
    %c0_14 = arith.constant 0 : index
    %c0_15 = arith.constant 0 : index
    %87 = vector.load %arg4[%c0_14, %c0_15] : memref<8x32xf32, #tpu.memory_space<vmem>>, vector<8x32xf32>
    tpu.vector_store %arg4[%c0_14, %c0_15], %86 {strides = array<i32>} : memref<8x32xf32, #tpu.memory_space<vmem>>, vector<8x32xf32>,
    return
  }
}

</mosaic_0001>

<bundles_post_ra>
// kernel: tpu_custom_call.1
= control target key start
LH: loop header
LB: loop body
LE: loop exit
PB: predicated region body
PF: predicated region fallthrough
CT: control target
= control target key end

     0   :  { %v350_v4 = vmov 0.0   ;;  %s528_s0 = inlined_call_operand.vmem [shape: f32[8,32], index: 0, kind: input, shape index: {}]   ;;  %s529_s1 = inlined_call_operand.vmem [shape: f32[32,132], index: 1, kind: input, shape index: {}]   ;;  %s530_s2 = inlined_call_operand.vmem [shape: f32[1,132], index: 2, kind: input, shape index: {}]   ;;  %s531_s3 = inlined_call_operand.vmem [shape: f32[132,32], index: 3, kind: input, shape index: {}]   ;;  %s532_s4 = inlined_call_operand.hbm [shape: f32[8,32], index: 4, kind: output, shape index: {}]  }
   0x1   :  { %v26_v0 = vld [vmem:[%s529_s1 + $0x38] sm:$0xff]  ;;  %v25_v1 = vld [vmem:[%s529_s1 + $0x30] sm:$0xff]  ;;  %v24_v2 = vld [vmem:[%s529_s1 + $0x28] sm:$0xff]  ;;  %107 = vmatprep.mubr.f32.mxu0 %v350_v4  ;;  %221 = vmatprep.subr.mxu1 %v350_v4 }
   0x2   :  { %67 = vmatprep.subr.mxu0 %v26_v0  ;;  %v23_v3 = vld [vmem:[%s529_s1 + $0x20] sm:$0xff]  ;;  %v22_v5 = vld [vmem:[%s529_s1 + $0x18] sm:$0xff]  ;;  %v21_v6 = vld [vmem:[%s529_s1 + $0x10] sm:$0xff] }
   0x3   :  { %68 = vmatpush1.msra.mxu0 %v25_v1 }
   0x4   :  { %69 = vmatprep.subr.mxu0 %v24_v2 }
   0x5   :  { %9 = vsyncpa [#allocation3], 0  ;;  %70 = vmatpush1.msra.mxu0 %v23_v3  ;;  %v20_v7 = vld [vmem:[%s529_s1 + $0x8] sm:$0xff]  ;;  %v19_v8 = vld [vmem:[%s529_s1] sm:$0xff]  ;;  %vm533_vm0 = vcmask 261120   ;;  %v29_v10 = vlaneseq  ;;  %vm534_vm1 = vcmask 31744  }
   0x6   :  { %71 = vmatprep.subr.mxu0 %v22_v5  ;;  %v18_v9 = vld [vmem:[%s528_s0] sm:$0xff]  ;;  %v351_v24 = vmov 2   ;;  %v352_v25 = vmov 0   ;;  %v353_v29 = vmov 1   ;;  %v354_v30 = vmov 3   ;;  %v213_v31 = vld [vmem:[%s531_s3 + $0x78] sm:$0xff] }
   0x7   :  { %72 = vmatpush1.msra.mxu0 %v21_v6  ;;  %v411_v11 = vshrl.u32 %v29_v10, 7  ;;  %v417_v13 = vld [vmem:[%s530_s2] sm:$0x3]  ;;  %317 = vset.pattern.permute.xlu0 %v351_v24  ;;  %v212_v32 = vld [vmem:[%s531_s3 + $0x70] sm:$0xff]  ;;  %v211_v33 = vld [vmem:[%s531_s3 + $0x68] sm:$0xff]  ;;  %v128_v39 = vand.u32 127, %v29_v10 }
   0x8   :  { %73 = vmatprep.subr.mxu0 %v20_v7  ;;  %315 = vset.pattern.permute.xlu1 %v352_v25  ;;  %v210_v34 = vld [vmem:[%s531_s3 + $0x60] sm:$0xff]  ;;  %v209_v35 = vld [vmem:[%s531_s3 + $0x58] sm:$0xff]  ;;  %v208_v36 = vld [vmem:[%s531_s3 + $0x50] sm:$0xff] }
   0x9   :  { %74 = vmatpush1.msra.mxu0 %v19_v8  ;;  %v35_v12 = vsub.s32 1, %v411_v11  ;;  %222 = vmatpush1.msra.mxu1 %v213_v31  ;;  %v207_v37 = vld [vmem:[%s531_s3 + $0x48] sm:$0xff]  ;;  %v206_v38 = vld [vmem:[%s531_s3 + $0x40] sm:$0xff]  ;;  %vm157_vm2 = vcmp.gt.s32.totalorder %v128_v39, 2  ;;  %vm136_vm4 = vcmp.gt.s32.totalorder %v128_v39, 0  ;;  %vm146_vm10 = vcmp.gt.s32.totalorder %v128_v39, 1 }
   0xa   :  { %306 = vmatmul.mubr.msk.f32.vlgmr.msra.gmra.mxu0 %vm533_vm0, %v18_v9  ;;  %223 = vmatprep.subr.mxu1 %v350_v4  ;;  %v205_v50 = vld [vmem:[%s531_s3 + $0x38] sm:$0xff]  ;;  %v204_v51 = vld [vmem:[%s531_s3 + $0x30] sm:$0xff]  ;;  %v203_v54 = vld [vmem:[%s531_s3 + $0x28] sm:$0xff]  ;;  %v31_v62 = vsub.s32 0, %v411_v11 }
   0xb   :  { %v36_v14 = vrot.slane %v417_v13, %v35_v12  ;;  %224 = vmatpush1.msra.mxu1 %v212_v32  ;;  %v202_v55 = vld [vmem:[%s531_s3 + $0x20] sm:$0xff]  ;;  %v201_v56 = vld [vmem:[%s531_s3 + $0x18] sm:$0xff]  ;;  %v200_v57 = vld [vmem:[%s531_s3 + $0x10] sm:$0xff] }
   0xc   :  { %225 = vmatprep.subr.mxu1 %v350_v4  ;;  %v199_v58 = vld [vmem:[%s531_s3 + $0x8] sm:$0xff]  ;;  %v198_v59 = vld [vmem:[%s531_s3] sm:$0xff]  ;;  %v32_v0 = vrot.slane %v417_v13, %v31_v62 }
   0xd   :  { %226 = vmatpush1.msra.mxu1 %v211_v33  ;;  %v214_v60 = vld [vmem:[%s531_s3 + $0x80] sm:$0xf]  ;;  %s355_s3 = smov [#allocation2]  }
   0xe   :  { %227 = vmatprep.subr.mxu1 %v350_v4  ;;  %s298_s11 = sshll.u32 %s355_s3, 4  ;;  %s299_s11 = int_to_ptr.vmem [resolvable:$true] %s298_s11 }
   0xf   :  { %228 = vmatpush1.msra.mxu1 %v210_v34  ;;  %s328_s12 = scalar_lea.vmem %s299_s11, 128  ;;  %p333_p1 = scmp.lt.s32.totalorder %s299_s11, %s299_s11 }
  0x10   :  { %229 = vmatprep.subr.mxu1 %v350_v4  ;;  %p329_p0 = scmp.ne.s32.totalorder %s299_s11, %s328_s12  ;;  %p334_p2 = scmp.lt.s32.totalorder %s328_s12, %s328_s12 }
  0x11   :  { %230 = vmatpush1.msra.mxu1 %v209_v35 }
  0x12   :  { %231 = vmatprep.subr.mxu1 %v350_v4  ;;  %p335_p3 = por %p334_p2, %p333_p1 }
  0x13   :  { %232 = vmatpush1.msra.mxu1 %v208_v36 }
  0x14   :  { %233 = vmatprep.subr.mxu1 %v350_v4  ;;  %p336_p4 = pnand %p335_p3, %p329_p0 }
  0x15   :  { %234 = vmatpush1.msra.mxu1 %v207_v37 }
  0x16   :  { %235 = vmatprep.subr.mxu1 %v350_v4 }
  0x17   :  { %236 = vmatpush1.msra.mxu1 %v206_v38 }
  0x18   :  { %237 = vmatprep.subr.mxu1 %v350_v4 }
  0x19   :  { %238 = vmatpush1.msra.mxu1 %v205_v50 }
  0x1a   :  { %239 = vmatprep.subr.mxu1 %v350_v4 }
  0x1b   :  { %240 = vmatpush1.msra.mxu1 %v204_v51 }
  0x1c   :  { %241 = vmatprep.subr.mxu1 %v350_v4 }
  0x1d   :  { %242 = vmatpush1.msra.mxu1 %v203_v54 }
  0x1e   :  { %243 = vmatprep.subr.mxu1 %v350_v4 }
  0x1f   :  { %244 = vmatpush1.msra.mxu1 %v202_v55 }
  0x20   :  { %245 = vmatprep.subr.mxu1 %v350_v4 }
  0x21   :  { %246 = vmatpush1.msra.mxu1 %v201_v56 }
  0x22   :  { %247 = vmatprep.subr.mxu1 %v350_v4 }
  0x23   :  { %248 = vmatpush1.msra.mxu1 %v200_v57 }
  0x24   :  { %249 = vmatprep.subr.mxu1 %v350_v4 }
  0x25   :  { %250 = vmatpush1.msra.mxu1 %v199_v58 }
  0x26   :  { %251 = vmatprep.subr.mxu1 %v350_v4 }
  0x27   :  { %252 = vmatpush1.msra.mxu1 %v198_v59 }
  0x28   :  { %283 = vmatprep.subr.mxu1 %v350_v4 }
  0xca   :  { %v420_v15 = vpop.f32.mrf.mxu0 }
  0xcb   :  { %v110_v2 = vadd.f32 %v420_v15, %v32_v0 }
  0xcc   :  { %v111_v16 = vpop.f32.mrf.mxu0 }
  0xcd   :  { %v112_v17 = vadd.f32 %v111_v16, %v36_v14  ;;  %v114_v5 = vmax.f32 %v110_v2, 0.0 }
  0xcf   :  { %v116_v18 = vsel %vm534_vm1, %v112_v17, -inf }
  0xd0   :  { %117 = vmax.xlane.f32.xlu0 %v116_v18 }
 0x159   :  { %v118_v19 = vpop.xlane.xlu0 %117 }
 0x15a   :  { %v119_v20 = vsub.f32 %v112_v17, %v118_v19 }
 0x15c   :  { %v120_v21 = vmul.f32 1.442695, %v119_v20 }
 0x15e   :  { %324 = vpow2.f32 %v120_v21 }
 0x16b   :  { %v325_v22 = vpop.eup %324 }
 0x16c   :  { %v122_v23 = vsel %vm534_vm1, %v325_v22, 0.0  ;;  %vm168_vm1 = vcmp.gt.s32.totalorder %v128_v39, 3 }
 0x16d   :  { %123 = vadd.xlane.f32.xlu0 %v122_v23 }
 0x1f6   :  { %v124_v26 = vpop.xlane.xlu0 %123 }
 0x1f7   :  { %326 = vrcp.f32 %v124_v26 }
 0x204   :  { %v327_v27 = vpop.eup %326 }
 0x205   :  { %v426_v28 = vmul.f32 %v327_v27, %v325_v22 }
 0x207   :  { %152 = vperm.xlu0 %317, %v426_v28   ;;  %131 = vperm.xlu1 %315, %v426_v28  }
 0x20b   :  { %316 = vset.pattern.permute.xlu1 %v353_v29  ;;  %323 = vset.pattern.permute.xlu0 %v354_v30 }
 0x20c   :  { %141 = vperm.xlu1 %316, %v426_v28  }
 0x210   :  { %318 = vset.pattern.permute.xlu1 %v354_v30 }
 0x211   :  { %163 = vperm.xlu1 %318, %v426_v28  }
 0x215   :  { %319 = vset.pattern.permute.xlu1 %v352_v25 }
 0x282   :  { %v153_v40 = vpop.permute.xlu0 %152  ;;  %v132_v41 = vpop.permute.xlu1 %131 }
 0x283   :  { %vm156_vm3 = vcmp.eq.f32.partialorder %v153_v40, %v426_v28  ;;  %vm135_vm5 = vcmp.eq.f32.partialorder %v132_v41, %v426_v28  ;;  %vm155_vm6 = vcmp.gt.f32.partialorder %v153_v40, %v426_v28  ;;  %vm134_vm8 = vcmp.gt.f32.partialorder %v132_v41, %v426_v28 }
 0x284   :  { %vm158_vm7 = vmand %vm156_vm3, %vm157_vm2 }
 0x285   :  { %vm137_vm9 = vmand %vm135_vm5, %vm136_vm4 }
 0x286   :  { %vm159_vm11 = vmor %vm155_vm6, %vm158_vm7  ;;  %vm217_vm6 = vcmask 1043456   ;;  %vm193_vm7 = vcmask 523264  }
 0x287   :  { %v142_v42 = vpop.permute.xlu1 %141  ;;  %vm138_vm12 = vmor %vm134_vm8, %vm137_vm9  ;;  %v160_v47 = vsel %vm159_vm11, 1, %v352_v25  ;;  %307 = vmatpush2.msk.msra.mxu1 %vm217_vm6, %v214_v60  ;;  %vm195_vm8 = vcmask 785408   ;;  %vm536_vm9 = vcmask 261120  }
 0x288   :  { %vm144_vm13 = vcmp.gt.f32.partialorder %v142_v42, %v426_v28  ;;  %vm145_vm14 = vcmp.eq.f32.partialorder %v142_v42, %v426_v28  ;;  %v139_v43 = vsel %vm138_vm12, 1, %v352_v25 }
 0x289   :  { %vm147_vm15 = vmand %vm145_vm14, %vm146_vm10 }
 0x28a   :  { %vm148_vm0 = vmor %vm144_vm13, %vm147_vm15 }
 0x28b   :  { %v149_v44 = vsel %vm148_vm0, 1, %v352_v25  ;;  %vm537_vm10 = vmmov %vm536_vm9 }
 0x28c   :  { %v150_v45 = vadd.s32 %v149_v44, %v139_v43  ;;  %v164_v46 = vpop.permute.xlu1 %163 }
 0x28d   :  { %vm166_vm2 = vcmp.gt.f32.partialorder %v164_v46, %v426_v28  ;;  %vm167_vm3 = vcmp.eq.f32.partialorder %v164_v46, %v426_v28 }
 0x28e   :  { %v161_v48 = vadd.s32 %v160_v47, %v150_v45  ;;  %vm169_vm4 = vmand %vm167_vm3, %vm168_vm1  ;;  %vm535_vm1 = vcmask 31744  }
 0x28f   :  { %vm170_vm5 = vmor %vm166_vm2, %vm169_vm4 }
 0x290   :  { %v171_v49 = vsel %vm170_vm5, 1, %v352_v25 }
 0x291   :  { %v172_v52 = vadd.s32 %v171_v49, %v161_v48 }
 0x293   :  { %vm173_vm0 = vcmp.lt.s32.totalorder %v172_v52, 2 }
 0x294   :  { %v174_v53 = vsel %vm173_vm0, %v426_v28, 0.0 }
 0x295   :  { %177 = vperm.xlu1 %319, %v174_v53   ;;  %308 = vmatprep.mubr.msk.f32.mxu1 %vm535_vm1, %v174_v53 }
 0x299   :  { %320 = vset.pattern.permute.xlu1 %v353_v29 }
 0x29a   :  { %181 = vperm.xlu1 %320, %v174_v53  }
 0x29e   :  { %321 = vset.pattern.permute.xlu1 %v351_v24 }
 0x29f   :  { %185 = vperm.xlu1 %321, %v174_v53  }
 0x2a3   :  { %322 = vset.pattern.permute.xlu1 %v354_v30 }
 0x2a4   :  { %189 = vperm.xlu1 %322, %v174_v53  }
 0x310   :  { %v178_v61 = vpop.permute.xlu1 %177 }
 0x315   :  { %v182_v63 = vpop.permute.xlu1 %181 }
 0x316   :  { %v192_v3 = vsel %vm536_vm9, %v178_v61, %v182_v63 }
 0x31a   :  { %v186_v1 = vpop.permute.xlu1 %185 }
 0x31b   :  { %v194_v6 = vsel %vm193_vm7, %v192_v3, %v186_v1 }
 0x31f   :  { %v190_v7 = vpop.permute.xlu1 %189 }
 0x320   :  { %v196_v8 = vsel %vm195_vm8, %v194_v6, %v190_v7 }
 0x321   :  { %v197_v4 = vmul.f32 %v196_v8, %v114_v5 }
 0x323   :  { %286 = vmatmul.mubr.f32.vlgmr.msra.gmra.mxu1 %v197_v4 }
 0x3e3   :  { %v287_v9 = vpop.f32.mrf.mxu1 }
 0x3e4   :  { %291 = vst.msk [vmem:[#allocation2] sm:$0xff] %vm537_vm10, %v287_v9 }
 0x3e5   :  { %v289_v10 = vpop.f32.mrf.mxu1 }
 0x3e6   :  { %339 = shalt.err (!%p336_p4)
}
 0x3e7   :  { %301 = dma.vmem_to_hbm [thread:$0]  %s299_s11, 128, %s532_s4, [#allocation3]  }
 0x3e8   :  { %348 = dma.done.wait [#allocation3], 128  }
 0x3e9   :  { %349 = vsyncadd [#allocation3], 4294967168 }
 0x3ea   :  { %305 = vsyncpa [#allocation3], 1 }

</bundles_post_ra>
